<compile_context>
chip_gen: v7x
topology: tpu7x:2x2x1
jax: 0.10.0
libtpu: 0.0.40
codegen_flags: <defaults>
</compile_context>

<pallas_src>
import functools

import jax
import jax.numpy as jnp
from jax.experimental import pallas as pl
from jax.experimental.pallas import tpu as pltpu


def _round_up(x, m):
    return ((x + m - 1) // m) * m


def _cdiv(a, b):
    return -(-a // b)


def _chip_config():
    """(num_tensorcores, vmem_budget_bytes, vmem_limit_bytes) by TPU generation."""
    try:
        kind = jax.devices()[0].device_kind.lower()
    except Exception:
        kind = ""
    if "v7" in kind:
        # 64 MiB physical VMEM, 2 TensorCores per chip.
        return 2, 22 * 1024 * 1024, 32 * 1024 * 1024
    # v5e / v6e: 128 MiB physical VMEM, 1 TensorCore.
    return 1, 48 * 1024 * 1024, 64 * 1024 * 1024


def _kl_loss_kernel(pred_ref, label_ref, out_ref, *, true_b, tile_b):
    # One (tile_b, C) batch tile per grid step; all hot-path math in f32.
    pred = pred_ref[...].astype(jnp.float32)
    label = label_ref[...].astype(jnp.float32)

    # log_softmax(prediction, axis=1) pieces (numerically stable).
    m1 = jnp.max(pred, axis=1, keepdims=True)
    z1 = pred - m1
    lse1 = jnp.log(jnp.sum(jnp.exp(z1), axis=1, keepdims=True))       # (TB, 1)

    # softmax(label * 10, axis=1) pieces (numerically stable).
    t = label * 10.0
    m2 = jnp.max(t, axis=1, keepdims=True)
    z2 = t - m2
    e2 = jnp.exp(z2)
    s2 = jnp.sum(e2, axis=1, keepdims=True)                           # (TB, 1)

    # Fused per-row KL (uses sum(q) == 1):
    #   sum_j q*(log q - log p) = sum_j e2*(z2 - z1)/s2 - log(s2) + lse1
    num = jnp.sum(e2 * (z2 - z1), axis=1, keepdims=True)              # (TB, 1)
    row_kl = num * pl.reciprocal(s2) - jnp.log(s2) + lse1             # (TB, 1)

    # Mask rows past the true batch size: Pallas out-of-bounds block rows contain
    # unspecified data (NOT zeros).  The math above is purely per-row, so any NaN/Inf
    # in a garbage row cannot leak into the selected branch of this where.
    row0 = pl.program_id(0) * tile_b
    row_ids = jax.lax.broadcasted_iota(jnp.int32, row_kl.shape, 0) + row0
    row_kl = jnp.where(row_ids < true_b, row_kl, 0.0)

    # Lane-aligned per-tile partial sum; independent per tile -> 'parallel' grid axis.
    partial = jnp.sum(row_kl)
    out_ref[...] = jnp.full(out_ref.shape, partial, dtype=out_ref.dtype)


def _kl_loss_jax(prediction, label):
    # Pure-JAX fast path for tiny inputs (pallas_call launch overhead dominates there).
    C = prediction.shape[1]
    log_p = jax.nn.log_softmax(prediction.astype(jnp.float32), axis=1)
    t = label.astype(jnp.float32) * 10.0
    q = jax.nn.softmax(t, axis=1)
    log_q = jax.nn.log_softmax(t, axis=1)
    return jnp.sum(q * (log_q - log_p)) / jnp.float32(C)


def kl_loss(prediction, label, *, force_pallas=False):
    assert prediction.shape == label.shape and prediction.ndim == 2
    B, C = prediction.shape
    itemsize = jnp.dtype(prediction.dtype).itemsize

    # Small-input fast path: below ~256 KiB of total input, XLA-fused jnp is faster.
    if not force_pallas and 2 * B * C * itemsize < 256 * 1024:
        return _kl_loss_jax(prediction, label)

    num_cores, vmem_budget, vmem_limit = _chip_config()

    # ---- batch-tile selection ------------------------------------------------
    # Sublane granularity depends on dtype packing (f32: 8, bf16: 16, i8: 32).
    sub = max(8, 32 // itemsize)
    # Per-row VMEM footprint: 2 inputs x 2 pipeline buffers x itemsize (DMA)
    # + ~8 f32 full-tile temps (two casts, z1, exp(z1), z2, e2, e2*(z2-z1), slack).
    footprint_per_row = (4 * itemsize + 8 * 4) * C
    max_tb = max(sub, (vmem_budget // footprint_per_row) // sub * sub)
    # Byte-based target: ~4 MiB per input block amortizes ~0.35 us per grid step.
    tb_target = max(sub, (4 * 1024 * 1024 // (C * itemsize)) // sub * sub)
    tb = min(tb_target, max_tb, _round_up(B, sub))
    # v7x megacore: make sure both TensorCores get at least one tile when possible.
    if num_cores > 1 and B > sub:
        tb = min(tb, _round_up(_cdiv(B, num_cores), sub))
    tb = max(sub, (tb // sub) * sub)
    nt = _cdiv(B, tb)
    # TODO(synk): if C alone overflows even a (sub, C) tile, add a second 'arbitrary'
    # grid axis over C with an online-softmax (running max/sum) formulation.

    partials = pl.pallas_call(
        functools.partial(_kl_loss_kernel, true_b=B, tile_b=tb),
        out_shape=jax.ShapeDtypeStruct((nt, 8, 128), jnp.float32),
        grid=(nt,),
        in_specs=[
            pl.BlockSpec((tb, C), lambda i: (i, 0)),
            pl.BlockSpec((tb, C), lambda i: (i, 0)),
        ],
        out_specs=pl.BlockSpec((1, 8, 128), lambda i: (i, 0, 0)),
        compiler_params=pltpu.CompilerParams(
            dimension_semantics=("parallel",),
            vmem_limit_bytes=vmem_limit,
        ),
        cost_estimate=pl.CostEstimate(
            flops=10 * B * C,
            transcendentals=2 * B * C,
            bytes_accessed=2 * B * C * itemsize + nt * 8 * 128 * 4,
        ),
    )(prediction, label)

    total = jnp.sum(partials[:, 0, 0])
    # 'mean' reduction * batch_size  ==  sum(kl) / (B*C) * B  ==  sum(kl) / C
    return total / jnp.float32(C)


def kl_loss_ref(prediction, label):
    # Pure-JAX reference mirroring the PyTorch module exactly.
    B, C = prediction.shape
    log_p = jax.nn.log_softmax(prediction.astype(jnp.float32), axis=1)
    t = label.astype(jnp.float32) * 10.0
    q = jax.nn.softmax(t, axis=1)
    log_q = jax.nn.log_softmax(t, axis=1)
    kl = q * (log_q - log_p)
    return (jnp.sum(kl) / (B * C)) * B


if __name__ == "__main__":
    key = jax.random.PRNGKey(0)
    k1, k2, k3, k4, k5, k6 = jax.random.split(key, 6)

    # 1) Small (batch, num_classes), forced through the Pallas kernel.
    B, C = 8, 128
    prediction = jax.random.normal(k1, (B, C), dtype=jnp.float32)
    label = jax.random.normal(k2, (B, C), dtype=jnp.float32)
    loss = jax.block_until_ready(kl_loss(prediction, label, force_pallas=True))
    ref = jax.block_until_ready(kl_loss_ref(prediction, label))
    assert jnp.allclose(loss, ref, rtol=1e-4, atol=1e-5), (loss, ref)

    # 2) Ragged batch + non-128 class count + bf16 inputs (exercises in-kernel row mask).
    B2, C2 = 12, 96
    p2 = jax.random.normal(k3, (B2, C2), dtype=jnp.bfloat16)
    l2 = jax.random.normal(k4, (B2, C2), dtype=jnp.bfloat16)
    loss2 = jax.block_until_ready(kl_loss(p2, l2, force_pallas=True))
    ref2 = jax.block_until_ready(kl_loss_ref(p2, l2))
    assert jnp.allclose(loss2, ref2, rtol=1e-3, atol=1e-3), (loss2, ref2)

    # 3) Larger ragged batch taking the auto-tiled Pallas path (and nt>=2 on v7x).
    B3, C3 = 1234, 384
    p3 = jax.random.normal(k5, (B3, C3), dtype=jnp.float32)
    l3 = jax.random.normal(k6, (B3, C3), dtype=jnp.float32)
    loss3 = jax.block_until_ready(kl_loss(p3, l3))
    ref3 = jax.block_until_ready(kl_loss_ref(p3, l3))
    assert jnp.allclose(loss3, ref3, rtol=1e-4, atol=1e-4), (loss3, ref3)

    # 4) Tiny input via the pure-JAX fast path.
    loss4 = jax.block_until_ready(kl_loss(prediction, label))
    assert jnp.allclose(loss4, ref, rtol=1e-4, atol=1e-5), (loss4, ref)

    print("KERNEL_OK")
</pallas_src>

<mosaic_0001>
module attributes {stable_mosaic.version = 11 : i64} {
  func.func @_kl_loss_kernel(%arg0: i32, %arg1: memref<8x128xf32, #tpu.memory_space<vmem>>, %arg2: memref<8x128xf32, #tpu.memory_space<vmem>>, %arg3: memref<1x8x128xf32, #tpu.memory_space<vmem>>) attributes {dimension_semantics = [#tpu.dimension_semantics<parallel>], iteration_bounds = array<i64: 1>, scalar_prefetch = 0 : i64, scratch_operands = 0 : i64, tpu.core_type = #tpu.core_type<tc>, window_params = [{transform_indices = @transform_0, window_bounds = array<i64: 8, 128>}, {transform_indices = @transform_1, window_bounds = array<i64: 8, 128>}, {transform_indices = @transform_2, window_bounds = array<i64: 1, 8, 128>}]} {
    %c0 = arith.constant 0 : index
    %c0_0 = arith.constant 0 : index
    %0 = vector.load %arg1[%c0, %c0_0] : memref<8x128xf32, #tpu.memory_space<vmem>>, vector<8x128xf32>
    %c0_1 = arith.constant 0 : index
    %c0_2 = arith.constant 0 : index
    %1 = vector.load %arg2[%c0_1, %c0_2] : memref<8x128xf32, #tpu.memory_space<vmem>>, vector<8x128xf32>
    %cst = arith.constant dense<0xFF800000> : vector<8xf32>
    %2 = vector.multi_reduction <maximumf>, %0, %cst [1] : vector<8x128xf32> to vector<8xf32>
    %3 = vector.shape_cast %2 : vector<8xf32> to vector<8x1xf32>
    %4 = vector.broadcast %3 : vector<8x1xf32> to vector<8x128xf32>
    %5 = arith.subf %0, %4 : vector<8x128xf32>
    %6 = math.exp %5 : vector<8x128xf32>
    %cst_3 = arith.constant dense<0.000000e+00> : vector<8xf32>
    %7 = vector.multi_reduction <add>, %6, %cst_3 [1] : vector<8x128xf32> to vector<8xf32>
    %8 = vector.shape_cast %7 : vector<8xf32> to vector<8x1xf32>
    %9 = math.log %8 : vector<8x1xf32>
    %cst_4 = arith.constant 1.000000e+01 : f32
    %10 = vector.broadcast %cst_4 : f32 to vector<8x128xf32>
    %11 = arith.mulf %1, %10 : vector<8x128xf32>
    %cst_5 = arith.constant dense<0xFF800000> : vector<8xf32>
    %12 = vector.multi_reduction <maximumf>, %11, %cst_5 [1] : vector<8x128xf32> to vector<8xf32>
    %13 = vector.shape_cast %12 : vector<8xf32> to vector<8x1xf32>
    %14 = vector.broadcast %13 : vector<8x1xf32> to vector<8x128xf32>
    %15 = arith.subf %11, %14 : vector<8x128xf32>
    %16 = math.exp %15 : vector<8x128xf32>
    %cst_6 = arith.constant dense<0.000000e+00> : vector<8xf32>
    %17 = vector.multi_reduction <add>, %16, %cst_6 [1] : vector<8x128xf32> to vector<8xf32>
    %18 = vector.shape_cast %17 : vector<8xf32> to vector<8x1xf32>
    %19 = arith.subf %15, %5 : vector<8x128xf32>
    %20 = arith.mulf %16, %19 : vector<8x128xf32>
    %cst_7 = arith.constant dense<0.000000e+00> : vector<8xf32>
    %21 = vector.multi_reduction <add>, %20, %cst_7 [1] : vector<8x128xf32> to vector<8xf32>
    %22 = vector.shape_cast %21 : vector<8xf32> to vector<8x1xf32>
    %23 = tpu.reciprocal %18 : vector<8x1xf32> -> vector<8x1xf32>
    %24 = arith.mulf %22, %23 : vector<8x1xf32>
    %25 = math.log %18 : vector<8x1xf32>
    %26 = arith.subf %24, %25 : vector<8x1xf32>
    %27 = arith.addf %26, %9 : vector<8x1xf32>
    %c8_i32 = arith.constant 8 : i32
    %28 = arith.muli %arg0, %c8_i32 : i32
    %29 = tpu.iota {dimensions = array<i32: 0>} : vector<8x1xi32>
    %30 = vector.broadcast %28 : i32 to vector<8x1xi32>
    %31 = arith.addi %29, %30 : vector<8x1xi32>
    %c8_i32_8 = arith.constant 8 : i32
    %32 = vector.broadcast %c8_i32_8 : i32 to vector<8x1xi32>
    %33 = arith.cmpi slt, %31, %32 : vector<8x1xi32>
    %cst_9 = arith.constant 0.000000e+00 : f32
    %34 = vector.broadcast %cst_9 : f32 to vector<8x1xf32>
    %35 = arith.select %33, %27, %34 : vector<8x1xi1>, vector<8x1xf32>
    %36 = vector.shape_cast %35 : vector<8x1xf32> to vector<1x8x1xf32>
    %cst_10 = arith.constant dense<0.000000e+00> : vector<1xf32>
    %37 = vector.multi_reduction <add>, %36, %cst_10 [1, 2] : vector<1x8x1xf32> to vector<1xf32>
    %38 = vector.shape_cast %37 : vector<1xf32> to vector<1x1x1xf32>
    %39 = vector.extract %38[0, 0, 0] : f32 from vector<1x1x1xf32>
    %40 = vector.broadcast %39 : f32 to vector<1x8x128xf32>
    %c0_11 = arith.constant 0 : index
    %c0_12 = arith.constant 0 : index
    %c0_13 = arith.constant 0 : index
    %41 = vector.load %arg3[%c0_11, %c0_12, %c0_13] : memref<1x8x128xf32, #tpu.memory_space<vmem>>, vector<1x8x128xf32>
    tpu.vector_store %arg3[%c0_11, %c0_12, %c0_13], %40 {strides = array<i32>} : memref<1x8x128xf32, #tpu.memory_space<vmem>>, vector<1x8x128xf32>,
    return
  }
  func.func @transform_0(%arg0: i32) -> (i32, i32) {
    %c0_i32 = arith.constant 0 : i32
    %c0_i32_0 = arith.constant 0 : i32
    return %arg0, %c0_i32 : i32, i32
  }
  func.func @transform_1(%arg0: i32) -> (i32, i32) {
    %c0_i32 = arith.constant 0 : i32
    %c0_i32_0 = arith.constant 0 : i32
    return %arg0, %c0_i32 : i32, i32
  }
  func.func @transform_2(%arg0: i32) -> (i32, i32, i32) {
    %c0_i32 = arith.constant 0 : i32
    %c0_i32_0 = arith.constant 0 : i32
    %c0_i32_1 = arith.constant 0 : i32
    return %arg0, %c0_i32, %c0_i32_0 : i32, i32, i32
  }
}

</mosaic_0001>

<bundles_post_ra>
// kernel: tpu_custom_call.1
= control target key start
LH: loop header
LB: loop body
LE: loop exit
PB: predicated region body
PF: predicated region fallthrough
CT: control target
= control target key end

     0   :  { %7 = vsyncpa [#allocation3], 0  ;;  %s242_s0 = inlined_call_operand.hbm [shape: f32[8,128], index: 0, kind: input, shape index: {}]   ;;  %s243_s1 = inlined_call_operand.hbm [shape: f32[8,128], index: 1, kind: input, shape index: {}]   ;;  %s244_s2 = inlined_call_operand.hbm [shape: f32[1,8,128], index: 2, kind: output, shape index: {}]  }
   0x1   :  { %8 = vsyncpa [#allocation6], 0 }
   0x2   :  { %9 = vsyncpa [#allocation4], 0  ;;  %s188_s9 = smov [#allocation2]   ;;  %s189_s11 = smov [#allocation5]  }
   0x3   :  { %s16_s10 = sshll.u32 %s188_s9, 4  ;;  %s26_s12 = sshll.u32 %s189_s11, 4  ;;  %s17_s10 = int_to_ptr.vmem [resolvable:$true] %s16_s10  ;;  %s27_s12 = int_to_ptr.vmem [resolvable:$true] %s26_s12 }
   0x4   :  { %s116_s15 = scalar_lea.hbm %s242_s0, 128 }
   0x5   :  { %p117_p0 = scmp.ne.s32.totalorder %s242_s0, %s116_s15  ;;  %p120_p1 = scmp.lt.u32.totalorder %s116_s15, %s242_s0 }
   0x7   :  { %p122_p2 = pnand %p120_p1, %p117_p0 }
   0x9   :  { %125 = shalt.err (!%p122_p2)
}
   0xa   :  { %s126_s20 = scalar_lea.vmem %s17_s10, 128  ;;  %p131_p4 = scmp.lt.s32.totalorder %s17_s10, %s17_s10 }
   0xb   :  { %p127_p3 = scmp.ne.s32.totalorder %s17_s10, %s126_s20  ;;  %p132_p5 = scmp.lt.s32.totalorder %s126_s20, %s126_s20 }
   0xd   :  { %p133_p6 = por %p132_p5, %p131_p4 }
   0xf   :  { %p134_p7 = pnand %p133_p6, %p127_p3 }
  0x11   :  { %137 = shalt.err (!%p134_p7)
}
  0x12   :  { %19 = dma.hbm_to_vmem [thread:$0]  %s242_s0, 128, %s17_s10, [#allocation3]  }
  0x13   :  { %s138_s25 = scalar_lea.hbm %s243_s1, 128 }
  0x14   :  { %p139_p8 = scmp.ne.s32.totalorder %s243_s1, %s138_s25  ;;  %p142_p9 = scmp.lt.u32.totalorder %s138_s25, %s243_s1 }
  0x16   :  { %p144_p10 = pnand %p142_p9, %p139_p8 }
  0x18   :  { %147 = shalt.err (!%p144_p10)
}
  0x19   :  { %s148_s30 = scalar_lea.vmem %s27_s12, 128  ;;  %p153_p12 = scmp.lt.s32.totalorder %s27_s12, %s27_s12 }
  0x1a   :  { %p149_p11 = scmp.ne.s32.totalorder %s27_s12, %s148_s30  ;;  %p154_p13 = scmp.lt.s32.totalorder %s148_s30, %s148_s30 }
  0x1c   :  { %p155_p0 = por %p154_p13, %p153_p12 }
  0x1e   :  { %p156_p1 = pnand %p155_p0, %p149_p11 }
  0x20   :  { %159 = shalt.err (!%p156_p1)
}
  0x21   :  { %29 = dma.hbm_to_vmem [thread:$0]  %s243_s1, 128, %s27_s12, [#allocation6]  }
  0x22   :  { %182 = dma.done.wait [#allocation3], 128  }
  0x23   :  { %183 = vsyncadd [#allocation3], 4294967168 }
  0x24   :  { %184 = dma.done.wait [#allocation6], 128  }
  0x25   :  { %185 = vsyncadd [#allocation6], 4294967168  ;;  %v37_v0 = vld [vmem:[#allocation5] sm:$0xff]  ;;  %v36_v2 = vld [vmem:[#allocation2] sm:$0xff]  ;;  %vm72_vm0 = vcmask 7168   ;;  %s190_s1 = smov [#allocation7]  }
  0x26   :  { %v47_v1 = vmul.f32 10.0, %v37_v0  ;;  %s91_s4 = sshll.u32 %s190_s1, 4  ;;  %s92_s4 = int_to_ptr.vmem [resolvable:$true] %s91_s4 }
  0x27   :  { %s160_s6 = scalar_lea.vmem %s92_s4, 128  ;;  %p165_p3 = scmp.lt.s32.totalorder %s92_s4, %s92_s4 }
  0x28   :  { %48 = vmax.xlane.f32.xlu0 %v47_v1  ;;  %p161_p2 = scmp.ne.s32.totalorder %s92_s4, %s160_s6  ;;  %p166_p4 = scmp.lt.s32.totalorder %s160_s6, %s160_s6 }
  0x2a   :  { %p167_p5 = por %p166_p4, %p165_p3 }
  0x2c   :  { %38 = vmax.xlane.f32.xlu0 %v36_v2  ;;  %p168_p6 = pnand %p167_p5, %p161_p2 }
  0xb5   :  { %v49_v3 = vpop.xlane.xlu0 %48 }
  0xb6   :  { %v50_v4 = vsub.f32 %v47_v1, %v49_v3 }
  0xb8   :  { %v51_v5 = vmul.f32 1.442695, %v50_v4 }
  0xb9   :  { %v39_v6 = vpop.xlane.xlu0 %38 }
  0xba   :  { %106 = vpow2.f32 %v51_v5  ;;  %v40_v7 = vsub.f32 %v36_v2, %v39_v6 }
  0xbc   :  { %v41_v8 = vmul.f32 1.442695, %v40_v7  ;;  %v55_v9 = vsub.f32 %v50_v4, %v40_v7 }
  0xbe   :  { %108 = vpow2.f32 %v41_v8 }
  0xc4   :  { %v107_v10 = vpop.eup %106 }
  0xc5   :  { %53 = vadd.xlane.f32.xlu1 %v107_v10  ;;  %v56_v11 = vmul.f32 %v107_v10, %v55_v9 }
  0xc7   :  { %57 = vadd.xlane.f32.xlu0 %v56_v11 }
  0xc8   :  { %v109_v12 = vpop.eup %108 }
  0xc9   :  { %43 = vadd.xlane.f32.xlu1 %v109_v12 }
 0x152   :  { %v54_v13 = vpop.xlane.xlu1 %53 }
 0x153   :  { %110 = vrcp.f32 %v54_v13 }
 0x154   :  { %112 = vlog2.f32 %v54_v13  ;;  %v58_v16 = vpop.xlane.xlu0 %57 }
 0x156   :  { %v44_v14 = vpop.xlane.xlu1 %43 }
 0x157   :  { %114 = vlog2.f32 %v44_v14 }
 0x15d   :  { %v111_v15 = vpop.eup %110 }
 0x15e   :  { %v113_v17 = vpop.eup %112  ;;  %v60_v18 = vmul.f32 %v111_v15, %v58_v16 }
 0x15f   :  { %v62_v19 = vmul.f32 0.6931472, %v113_v17 }
 0x161   :  { %v115_v20 = vpop.eup %114  ;;  %v63_v21 = vsub.f32 %v60_v18, %v62_v19 }
 0x162   :  { %v46_v22 = vmul.f32 0.6931472, %v115_v20 }
 0x164   :  { %v64_v23 = vadd.f32 %v63_v21, %v46_v22 }
 0x166   :  { %v73_v24 = vsel %vm72_vm0, %v64_v23, 0.0 }
 0x167   :  { %74 = vadd.xlane.f32.xlu1 %v73_v24 }
 0x1f4   :  { %v75_v25 = vpop.xlane.xlu1 %74 }
 0x1f5   :  { %v76_v26 = vrot.slane %v75_v25, 4 }
 0x1f7   :  { %v77_v27 = vadd.f32 %v76_v26, %v75_v25 }
 0x1f9   :  { %v78_v28 = vrot.slane %v77_v27, 2 }
 0x1fb   :  { %v79_v29 = vadd.f32 %v78_v28, %v77_v27 }
 0x1fd   :  { %v80_v30 = vrot.slane %v79_v29, 1 }
 0x1ff   :  { %v81_v31 = vadd.f32 %v80_v30, %v79_v29 }
 0x201   :  { %101 = vpush %v81_v31 }
 0x232   :  { %s102_s5 = spop %101 }
 0x233   :  { %v83_v32 = vstv %s102_s5 }
 0x234   :  { %84 = vst [vmem:[#allocation7] sm:$0xff] %v83_v32 }
 0x235   :  { %171 = shalt.err (!%p168_p6)
}
 0x236   :  { %s172_s9 = scalar_lea.hbm %s244_s2, 128 }
 0x237   :  { %p173_p7 = scmp.ne.s32.totalorder %s244_s2, %s172_s9  ;;  %p176_p8 = scmp.lt.u32.totalorder %s172_s9, %s244_s2 }
 0x239   :  { %p178_p9 = pnand %p176_p8, %p173_p7 }
 0x23b   :  { %181 = shalt.err (!%p178_p9)
}
 0x23c   :  { %94 = dma.vmem_to_hbm [thread:$0]  %s92_s4, 128, %s244_s2, [#allocation4]  }
 0x23d   :  { %186 = dma.done.wait [#allocation4], 128  }
 0x23e   :  { %187 = vsyncadd [#allocation4], 4294967168 }
 0x23f   :  { %98 = vsyncpa [#allocation3], 1 }
 0x240   :  { %99 = vsyncpa [#allocation6], 1 }
 0x241   :  { %100 = vsyncpa [#allocation4], 1 }

</bundles_post_ra>
